<compile_context>
chip_gen: v7x
topology: tpu7x:2x2x1
jax: 0.10.0
libtpu: 0.0.40
codegen_flags: <defaults>
</compile_context>

<pallas_src>
import functools

import jax
import jax.numpy as jnp
from jax.experimental import pallas as pl
from jax.experimental.pallas import tpu as pltpu


def _fold_block(x_ref, sum_acc, max_acc, *, bt, num_c, c_sub, lane_chunks,
                hw, masked, last_base):
    """Fold one (bt, num_c, lane_tile) x block into the running accumulators.

    Channels are processed in <=c_sub-row sub-blocks that stay register
    resident across the whole chunk loop (bounded vreg pressure at large C);
    the running (.., 128) accumulators are loaded/stored once per sub-block,
    not per 128-lane chunk.
    """
    for b in range(bt):
        for c0 in range(0, num_c, c_sub):
            cs = min(c_sub, num_c - c0)
            s = sum_acc[b, c0:c0 + cs, :]
            m = max_acc[b, c0:c0 + cs, :]
            lane = None
            if masked:
                lane = jax.lax.broadcasted_iota(jnp.int32, (cs, 128), 1)
            for j in range(lane_chunks):
                if masked and last_base + j * 128 >= hw:
                    break  # chunk lies entirely in the padded tail: skip it
                chunk = x_ref[b, c0:c0 + cs, pl.ds(j * 128, 128)].astype(
                    jnp.float32)
                if masked and last_base + (j + 1) * 128 > hw:
                    valid = (last_base + j * 128 + lane) < hw
                    s = s + jnp.where(valid, chunk, 0.0)
                    m = jnp.maximum(m, jnp.where(valid, chunk, -jnp.inf))
                else:
                    s = s + chunk
                    m = jnp.maximum(m, chunk)
            sum_acc[b, c0:c0 + cs, :] = s
            max_acc[b, c0:c0 + cs, :] = m


def _channel_attention_kernel(x_ref, w1_ref, b1_ref, w2_ref, b2_ref, o_ref,
                              sum_acc, max_acc, *, hw, lane_tile, lane_chunks,
                              num_k, bt, c_sub, needs_mask):
    # x_ref : (bt, C, lane_tile) block of the (B, C, H*W) input
    # w1_ref: (C, I)  b1_ref: (1, I)  w2_ref: (I, C)  b2_ref: (1, C)
    # o_ref : (bt, 1, C) output block (C on lanes -> lane-dense store)
    # sum_acc / max_acc: (bt, C, 128) f32 running accumulators
    k = pl.program_id(1)
    num_c = x_ref.shape[1]

    @pl.when(k == 0)
    def _init():
        sum_acc[...] = jnp.zeros_like(sum_acc)
        max_acc[...] = jnp.full(max_acc.shape, -jnp.inf, dtype=max_acc.dtype)

    fold = functools.partial(_fold_block, x_ref, sum_acc, max_acc, bt=bt,
                             num_c=num_c, c_sub=c_sub,
                             lane_chunks=lane_chunks, hw=hw,
                             last_base=(num_k - 1) * lane_tile)

    if needs_mask and num_k > 1:
        # Masking only on the final reduction step: the hot body is pure
        # load + add + max per chunk.
        @pl.when(k < num_k - 1)
        def _fold_unmasked():
            fold(masked=False)

        @pl.when(k == num_k - 1)
        def _fold_masked():
            fold(masked=True)
    else:
        fold(masked=needs_mask)

    # Epilogue: one cross-lane reduce (XLU) + the tiny MLP, last HW step only.
    @pl.when(k == num_k - 1)
    def _finalize():
        avg = jnp.sum(sum_acc[...], axis=-1) * (1.0 / hw)   # (bt, C), C on lanes
        mx = jnp.max(max_acc[...], axis=-1)                  # (bt, C)

        def mlp(p):  # p: (bt, C) -> (bt, C); runs once per batch block, tiny.
            h = jnp.dot(p, w1_ref[...], preferred_element_type=jnp.float32)
            h = jnp.maximum(h + b1_ref[...], 0.0)            # (bt, I)
            y = jnp.dot(h, w2_ref[...], preferred_element_type=jnp.float32)
            return jax.nn.sigmoid(y + b2_ref[...])           # (bt, C)

        o_ref[:, 0, :] = (mlp(avg) + mlp(mx)).astype(o_ref.dtype)


def channel_attention(x_nchw, w1, b1, w2, b2, *,
                      max_lane_tile=8192,
                      target_block_bytes=1 << 20,   # ~1 MiB per grid step
                      max_block_bytes=4 << 20):     # per pipeline buffer cap
    """x_nchw: (B, C, H, W).
    w1: (I, C, 1, 1), b1: (I,)  -- fc1 (Conv2d C -> I, 1x1)
    w2: (C, I, 1, 1), b2: (C,)  -- fc2 (Conv2d I -> C, 1x1)
    returns: (B, C, 1, 1)
    """
    B, C, H, W = x_nchw.shape
    I = w1.shape[0]
    HW = H * W
    itemsize = jnp.dtype(x_nchw.dtype).itemsize

    x = x_nchw.reshape(B, C, HW)
    # Conv2d 1x1 weights -> row-layout matrices so the MLP is pooled @ W with
    # channels on lanes (lane-dense epilogue + lane-dense output store).
    w1t = w1.reshape(I, C).T.astype(jnp.float32)       # (C, I)
    w2t = w2.reshape(C, I).T.astype(jnp.float32)       # (I, C)
    b1r = b1.reshape(1, I).astype(jnp.float32)
    b2r = b2.reshape(1, C).astype(jnp.float32)

    # --- spatial (lane) tile: balanced tail, multiple of 128, VMEM-capped ---
    lanes_cap = (max_block_bytes // max(1, C * itemsize)) // 128 * 128
    lanes_cap = max(128, min(max_lane_tile, lanes_cap))
    num_k = pl.cdiv(HW, lanes_cap)
    lane_tile = ((pl.cdiv(HW, num_k) + 127) // 128) * 128
    num_k = pl.cdiv(HW, lane_tile)
    lane_chunks = lane_tile // 128
    needs_mask = (num_k * lane_tile != HW)

    # --- batch-row blocking: grow per-step blocks toward target_block_bytes ---
    row_bytes = C * lane_tile * itemsize
    bt = max(1, min(B, target_block_bytes // max(1, row_bytes)))
    if B >= 2:
        # Keep >= 2 batch blocks so the "parallel" axis can feed both v7x TCs.
        bt = max(1, min(bt, B // 2))
    bt = max(d for d in range(1, bt + 1) if B % d == 0)   # bt must divide B
    num_b = B // bt

    c_sub = min(C, 64)   # channel rows per register-resident fold sub-block

    kernel = functools.partial(
        _channel_attention_kernel, hw=HW, lane_tile=lane_tile,
        lane_chunks=lane_chunks, num_k=num_k, bt=bt, c_sub=c_sub,
        needs_mask=needs_mask)

    bytes_accessed = (x.size * itemsize
                      + (w1t.size + w2t.size + b1r.size + b2r.size) * 4
                      + B * C * itemsize)
    flops = 2 * B * C * HW + 8 * B * C * I

    out = pl.pallas_call(
        kernel,
        out_shape=jax.ShapeDtypeStruct((B, 1, C), x_nchw.dtype),
        grid=(num_b, num_k),
        in_specs=[
            # x: bt batch rows, all C channels, one spatial tile.
            pl.BlockSpec((bt, C, lane_tile), lambda b, k: (b, 0, k)),
            # weights/biases: resident across the whole grid (constant maps).
            pl.BlockSpec((C, I), lambda b, k: (0, 0)),
            pl.BlockSpec((1, I), lambda b, k: (0, 0)),
            pl.BlockSpec((I, C), lambda b, k: (0, 0)),
            pl.BlockSpec((1, C), lambda b, k: (0, 0)),
        ],
        out_specs=pl.BlockSpec((bt, 1, C), lambda b, k: (b, 0, 0)),
        scratch_shapes=[
            pltpu.VMEM((bt, C, 128), jnp.float32),   # running sum
            pltpu.VMEM((bt, C, 128), jnp.float32),   # running max
        ],
        compiler_params=pltpu.CompilerParams(
            dimension_semantics=("parallel", "arbitrary"),
            vmem_limit_bytes=32 * 1024 * 1024),
        cost_estimate=pl.CostEstimate(flops=flops,
                                      transcendentals=2 * B * C,
                                      bytes_accessed=bytes_accessed),
    )(x, w1t, b1r, w2t, b2r)

    return out.reshape(B, C, 1, 1)


def channel_attention_ref(x_nchw, w1, b1, w2, b2):
    """Pure-JAX reference of the PyTorch ChannelAttention forward."""
    B, C, H, W = x_nchw.shape
    I = w1.shape[0]
    w1m = w1.reshape(I, C)
    w2m = w2.reshape(C, I)

    def mlp(p):  # p: (B, C)
        h = jnp.maximum(p @ w1m.T + b1, 0.0)
        return jax.nn.sigmoid(h @ w2m.T + b2)

    avg = jnp.mean(x_nchw, axis=(2, 3))
    mx = jnp.max(x_nchw, axis=(2, 3))
    return (mlp(avg) + mlp(mx)).reshape(B, C, 1, 1)


if __name__ == "__main__":
    key = jax.random.PRNGKey(0)
    kx, k1, kb1, k2, kb2, kx2 = jax.random.split(key, 6)

    B, C, H, W = 2, 16, 16, 16
    INTERNAL = C // 4   # channelAttention_reduce=4, as used inside CPCA

    x = jax.random.normal(kx, (B, C, H, W), dtype=jnp.float32)
    w1 = jax.random.normal(k1, (INTERNAL, C, 1, 1), dtype=jnp.float32) * 0.1
    b1 = jax.random.normal(kb1, (INTERNAL,), dtype=jnp.float32) * 0.1
    w2 = jax.random.normal(k2, (C, INTERNAL, 1, 1), dtype=jnp.float32) * 0.1
    b2 = jax.random.normal(kb2, (C,), dtype=jnp.float32) * 0.1

    out = jax.block_until_ready(channel_attention(x, w1, b1, w2, b2))
    ref = channel_attention_ref(x, w1, b1, w2, b2)
    assert out.shape == (B, C, 1, 1)
    assert jnp.allclose(out, ref, atol=1e-5, rtol=1e-5)

    # Second shape: H*W (169) is not a multiple of 128 -> exercises the
    # padded-lane masking path on the final (and only) reduction step.
    x2 = jax.random.normal(kx2, (B, C, 13, 13), dtype=jnp.float32)
    out2 = jax.block_until_ready(channel_attention(x2, w1, b1, w2, b2))
    ref2 = channel_attention_ref(x2, w1, b1, w2, b2)
    assert jnp.allclose(out2, ref2, atol=1e-5, rtol=1e-5)

    print("KERNEL_OK")
</pallas_src>

<mosaic_0001>
module attributes {stable_mosaic.version = 11 : i64} {
  func.func @_channel_attention_kernel(%arg0: i32, %arg1: i32, %arg2: memref<1x16x256xf32, #tpu.memory_space<vmem>>, %arg3: memref<16x4xf32, #tpu.memory_space<vmem>>, %arg4: memref<1x4xf32, #tpu.memory_space<vmem>>, %arg5: memref<4x16xf32, #tpu.memory_space<vmem>>, %arg6: memref<1x16xf32, #tpu.memory_space<vmem>>, %arg7: memref<1x1x16xf32, #tpu.memory_space<vmem>>, %arg8: memref<1x16x128xf32, #tpu.memory_space<vmem>>, %arg9: memref<1x16x128xf32, #tpu.memory_space<vmem>>) attributes {dimension_semantics = [#tpu.dimension_semantics<parallel>, #tpu.dimension_semantics<arbitrary>], iteration_bounds = array<i64: 2, 1>, scalar_prefetch = 0 : i64, scratch_operands = 2 : i64, tpu.core_type = #tpu.core_type<tc>, window_params = [{transform_indices = @transform_0, window_bounds = array<i64: 1, 16, 256>}, {pipeline_mode = #tpu.pipeline_mode<synchronous>, transform_indices = @transform_1, window_bounds = array<i64: 16, 4>}, {pipeline_mode = #tpu.pipeline_mode<synchronous>, transform_indices = @transform_2, window_bounds = array<i64: 1, 4>}, {pipeline_mode = #tpu.pipeline_mode<synchronous>, transform_indices = @transform_3, window_bounds = array<i64: 4, 16>}, {pipeline_mode = #tpu.pipeline_mode<synchronous>, transform_indices = @transform_4, window_bounds = array<i64: 1, 16>}, {transform_indices = @transform_5, window_bounds = array<i64: 1, 1, 16>}]} {
    %c0_i32 = arith.constant 0 : i32
    %0 = arith.cmpi eq, %arg1, %c0_i32 : i32
    %1 = arith.extui %0 : i1 to i32
    %c0_i32_0 = arith.constant 0 : i32
    %2 = arith.cmpi ne, %1, %c0_i32_0 : i32
    scf.if %2 {
      %cst = arith.constant 0.000000e+00 : f32
      %24 = vector.broadcast %cst : f32 to vector<1x16x128xf32>
      %c0_19 = arith.constant 0 : index
      %c0_20 = arith.constant 0 : index
      %c0_21 = arith.constant 0 : index
      %25 = vector.load %arg8[%c0_19, %c0_20, %c0_21] : memref<1x16x128xf32, #tpu.memory_space<vmem>>, vector<1x16x128xf32>
      tpu.vector_store %arg8[%c0_19, %c0_20, %c0_21], %24 {strides = array<i32>} : memref<1x16x128xf32, #tpu.memory_space<vmem>>, vector<1x16x128xf32>,
      %cst_22 = arith.constant 0xFF800000 : f32
      %26 = vector.broadcast %cst_22 : f32 to vector<1x16x128xf32>
      %c0_23 = arith.constant 0 : index
      %c0_24 = arith.constant 0 : index
      %c0_25 = arith.constant 0 : index
      %27 = vector.load %arg9[%c0_23, %c0_24, %c0_25] : memref<1x16x128xf32, #tpu.memory_space<vmem>>, vector<1x16x128xf32>
      tpu.vector_store %arg9[%c0_23, %c0_24, %c0_25], %26 {strides = array<i32>} : memref<1x16x128xf32, #tpu.memory_space<vmem>>, vector<1x16x128xf32>,
    } else {
    }
    %c0 = arith.constant 0 : index
    %c0_1 = arith.constant 0 : index
    %c0_2 = arith.constant 0 : index
    %3 = vector.load %arg8[%c0, %c0_1, %c0_2] : memref<1x16x128xf32, #tpu.memory_space<vmem>>, vector<1x16x128xf32>
    %4 = vector.shape_cast %3 : vector<1x16x128xf32> to vector<16x128xf32>
    %c0_3 = arith.constant 0 : index
    %c0_4 = arith.constant 0 : index
    %c0_5 = arith.constant 0 : index
    %5 = vector.load %arg9[%c0_3, %c0_4, %c0_5] : memref<1x16x128xf32, #tpu.memory_space<vmem>>, vector<1x16x128xf32>
    %6 = vector.shape_cast %5 : vector<1x16x128xf32> to vector<16x128xf32>
    %c0_6 = arith.constant 0 : index
    %c0_7 = arith.constant 0 : index
    %c0_8 = arith.constant 0 : index
    %7 = vector.load %arg2[%c0_6, %c0_7, %c0_8] : memref<1x16x256xf32, #tpu.memory_space<vmem>>, vector<1x16x128xf32>
    %8 = vector.shape_cast %7 : vector<1x16x128xf32> to vector<16x128xf32>
    %9 = arith.addf %4, %8 : vector<16x128xf32>
    %10 = arith.maximumf %6, %8 : vector<16x128xf32>
    %c0_9 = arith.constant 0 : index
    %c0_10 = arith.constant 0 : index
    %c128 = arith.constant 128 : index
    %11 = vector.load %arg2[%c0_9, %c0_10, %c128] : memref<1x16x256xf32, #tpu.memory_space<vmem>>, vector<1x16x128xf32>
    %12 = vector.shape_cast %11 : vector<1x16x128xf32> to vector<16x128xf32>
    %13 = arith.addf %9, %12 : vector<16x128xf32>
    %14 = arith.maximumf %10, %12 : vector<16x128xf32>
    %c0_11 = arith.constant 0 : index
    %c0_12 = arith.constant 0 : index
    %c0_13 = arith.constant 0 : index
    %15 = vector.load %arg8[%c0_11, %c0_12, %c0_13] : memref<1x16x128xf32, #tpu.memory_space<vmem>>, vector<1x16x128xf32>
    %16 = vector.shape_cast %15 : vector<1x16x128xf32> to vector<16x128xf32>
    %17 = vector.shape_cast %13 : vector<16x128xf32> to vector<1x16x128xf32>
    tpu.vector_store %arg8[%c0_11, %c0_12, %c0_13], %17 {strides = array<i32>} : memref<1x16x128xf32, #tpu.memory_space<vmem>>, vector<1x16x128xf32>,
    %c0_14 = arith.constant 0 : index
    %c0_15 = arith.constant 0 : index
    %c0_16 = arith.constant 0 : index
    %18 = vector.load %arg9[%c0_14, %c0_15, %c0_16] : memref<1x16x128xf32, #tpu.memory_space<vmem>>, vector<1x16x128xf32>
    %19 = vector.shape_cast %18 : vector<1x16x128xf32> to vector<16x128xf32>
    %20 = vector.shape_cast %14 : vector<16x128xf32> to vector<1x16x128xf32>
    tpu.vector_store %arg9[%c0_14, %c0_15, %c0_16], %20 {strides = array<i32>} : memref<1x16x128xf32, #tpu.memory_space<vmem>>, vector<1x16x128xf32>,
    %c0_i32_17 = arith.constant 0 : i32
    %21 = arith.cmpi eq, %arg1, %c0_i32_17 : i32
    %22 = arith.extui %21 : i1 to i32
    %c0_i32_18 = arith.constant 0 : i32
    %23 = arith.cmpi ne, %22, %c0_i32_18 : i32
    scf.if %23 {
      %c0_19 = arith.constant 0 : index
      %c0_20 = arith.constant 0 : index
      %c0_21 = arith.constant 0 : index
      %24 = vector.load %arg8[%c0_19, %c0_20, %c0_21] : memref<1x16x128xf32, #tpu.memory_space<vmem>>, vector<1x16x128xf32>
      %cst = arith.constant dense<0.000000e+00> : vector<1x16xf32>
      %25 = vector.multi_reduction <add>, %24, %cst [2] : vector<1x16x128xf32> to vector<1x16xf32>
      %cst_22 = arith.constant 3.906250e-03 : f32
      %26 = vector.broadcast %cst_22 : f32 to vector<1x16xf32>
      %27 = arith.mulf %25, %26 : vector<1x16xf32>
      %c0_23 = arith.constant 0 : index
      %c0_24 = arith.constant 0 : index
      %c0_25 = arith.constant 0 : index
      %28 = vector.load %arg9[%c0_23, %c0_24, %c0_25] : memref<1x16x128xf32, #tpu.memory_space<vmem>>, vector<1x16x128xf32>
      %cst_26 = arith.constant dense<0xFF800000> : vector<1x16xf32>
      %29 = vector.multi_reduction <maximumf>, %28, %cst_26 [2] : vector<1x16x128xf32> to vector<1x16xf32>
      %c0_27 = arith.constant 0 : index
      %c0_28 = arith.constant 0 : index
      %30 = vector.load %arg3[%c0_27, %c0_28] : memref<16x4xf32, #tpu.memory_space<vmem>>, vector<16x4xf32>
      %cst_29 = arith.constant dense<0.000000e+00> : vector<1x4xf32>
      %31 = tpu.matmul %27, %30, %cst_29 {dimension_numbers = #tpu.dot_dimension_numbers<[1], [0], [0], [1], [0, 0, 1, 1], [], []>} : vector<1x16xf32>, vector<16x4xf32>, vector<1x4xf32> -> vector<1x4xf32>
      %c0_30 = arith.constant 0 : index
      %c0_31 = arith.constant 0 : index
      %32 = vector.load %arg4[%c0_30, %c0_31] : memref<1x4xf32, #tpu.memory_space<vmem>>, vector<1x4xf32>
      %33 = arith.addf %31, %32 : vector<1x4xf32>
      %cst_32 = arith.constant 0.000000e+00 : f32
      %34 = vector.broadcast %cst_32 : f32 to vector<1x4xf32>
      %35 = arith.maximumf %33, %34 : vector<1x4xf32>
      %c0_33 = arith.constant 0 : index
      %c0_34 = arith.constant 0 : index
      %36 = vector.load %arg5[%c0_33, %c0_34] : memref<4x16xf32, #tpu.memory_space<vmem>>, vector<4x16xf32>
      %cst_35 = arith.constant dense<0.000000e+00> : vector<1x16xf32>
      %37 = tpu.matmul %35, %36, %cst_35 {dimension_numbers = #tpu.dot_dimension_numbers<[1], [0], [0], [1], [0, 0, 1, 1], [], []>} : vector<1x4xf32>, vector<4x16xf32>, vector<1x16xf32> -> vector<1x16xf32>
      %c0_36 = arith.constant 0 : index
      %c0_37 = arith.constant 0 : index
      %38 = vector.load %arg6[%c0_36, %c0_37] : memref<1x16xf32, #tpu.memory_space<vmem>>, vector<1x16xf32>
      %39 = arith.addf %37, %38 : vector<1x16xf32>
      %40 = arith.negf %39 : vector<1x16xf32>
      %41 = math.exp %40 : vector<1x16xf32>
      %cst_38 = arith.constant 1.000000e+00 : f32
      %42 = vector.broadcast %cst_38 : f32 to vector<1x16xf32>
      %43 = arith.addf %42, %41 : vector<1x16xf32>
      %44 = arith.divf %42, %43 : vector<1x16xf32>
      %c0_39 = arith.constant 0 : index
      %c0_40 = arith.constant 0 : index
      %45 = vector.load %arg3[%c0_39, %c0_40] : memref<16x4xf32, #tpu.memory_space<vmem>>, vector<16x4xf32>
      %cst_41 = arith.constant dense<0.000000e+00> : vector<1x4xf32>
      %46 = tpu.matmul %29, %45, %cst_41 {dimension_numbers = #tpu.dot_dimension_numbers<[1], [0], [0], [1], [0, 0, 1, 1], [], []>} : vector<1x16xf32>, vector<16x4xf32>, vector<1x4xf32> -> vector<1x4xf32>
      %c0_42 = arith.constant 0 : index
      %c0_43 = arith.constant 0 : index
      %47 = vector.load %arg4[%c0_42, %c0_43] : memref<1x4xf32, #tpu.memory_space<vmem>>, vector<1x4xf32>
      %48 = arith.addf %46, %47 : vector<1x4xf32>
      %cst_44 = arith.constant 0.000000e+00 : f32
      %49 = vector.broadcast %cst_44 : f32 to vector<1x4xf32>
      %50 = arith.maximumf %48, %49 : vector<1x4xf32>
      %c0_45 = arith.constant 0 : index
      %c0_46 = arith.constant 0 : index
      %51 = vector.load %arg5[%c0_45, %c0_46] : memref<4x16xf32, #tpu.memory_space<vmem>>, vector<4x16xf32>
      %cst_47 = arith.constant dense<0.000000e+00> : vector<1x16xf32>
      %52 = tpu.matmul %50, %51, %cst_47 {dimension_numbers = #tpu.dot_dimension_numbers<[1], [0], [0], [1], [0, 0, 1, 1], [], []>} : vector<1x4xf32>, vector<4x16xf32>, vector<1x16xf32> -> vector<1x16xf32>
      %c0_48 = arith.constant 0 : index
      %c0_49 = arith.constant 0 : index
      %53 = vector.load %arg6[%c0_48, %c0_49] : memref<1x16xf32, #tpu.memory_space<vmem>>, vector<1x16xf32>
      %54 = arith.addf %52, %53 : vector<1x16xf32>
      %55 = arith.negf %54 : vector<1x16xf32>
      %56 = math.exp %55 : vector<1x16xf32>
      %cst_50 = arith.constant 1.000000e+00 : f32
      %57 = vector.broadcast %cst_50 : f32 to vector<1x16xf32>
      %58 = arith.addf %57, %56 : vector<1x16xf32>
      %59 = arith.divf %57, %58 : vector<1x16xf32>
      %60 = arith.addf %44, %59 : vector<1x16xf32>
      %c0_51 = arith.constant 0 : index
      %c0_52 = arith.constant 0 : index
      %c0_53 = arith.constant 0 : index
      %61 = vector.load %arg7[%c0_51, %c0_52, %c0_53] : memref<1x1x16xf32, #tpu.memory_space<vmem>>, vector<1x1x16xf32>
      %62 = vector.shape_cast %61 : vector<1x1x16xf32> to vector<1x16xf32>
      %63 = vector.shape_cast %60 : vector<1x16xf32> to vector<1x1x16xf32>
      tpu.vector_store %arg7[%c0_51, %c0_52, %c0_53], %63 {strides = array<i32>} : memref<1x1x16xf32, #tpu.memory_space<vmem>>, vector<1x1x16xf32>,
    } else {
    }
    return
  }
  func.func @transform_0(%arg0: i32, %arg1: i32) -> (i32, i32, i32) {
    %c0_i32 = arith.constant 0 : i32
    %c0_i32_0 = arith.constant 0 : i32
    return %arg0, %c0_i32, %arg1 : i32, i32, i32
  }
  func.func @transform_1(%arg0: i32, %arg1: i32) -> (i32, i32) {
    %c0_i32 = arith.constant 0 : i32
    %c0_i32_0 = arith.constant 0 : i32
    %c0_i32_1 = arith.constant 0 : i32
    return %c0_i32, %c0_i32_0 : i32, i32
  }
  func.func @transform_2(%arg0: i32, %arg1: i32) -> (i32, i32) {
    %c0_i32 = arith.constant 0 : i32
    %c0_i32_0 = arith.constant 0 : i32
    %c0_i32_1 = arith.constant 0 : i32
    return %c0_i32, %c0_i32_0 : i32, i32
  }
  func.func @transform_3(%arg0: i32, %arg1: i32) -> (i32, i32) {
    %c0_i32 = arith.constant 0 : i32
    %c0_i32_0 = arith.constant 0 : i32
    %c0_i32_1 = arith.constant 0 : i32
    return %c0_i32, %c0_i32_0 : i32, i32
  }
  func.func @transform_4(%arg0: i32, %arg1: i32) -> (i32, i32) {
    %c0_i32 = arith.constant 0 : i32
    %c0_i32_0 = arith.constant 0 : i32
    %c0_i32_1 = arith.constant 0 : i32
    return %c0_i32, %c0_i32_0 : i32, i32
  }
  func.func @transform_5(%arg0: i32, %arg1: i32) -> (i32, i32, i32) {
    %c0_i32 = arith.constant 0 : i32
    %c0_i32_0 = arith.constant 0 : i32
    %c0_i32_1 = arith.constant 0 : i32
    return %arg0, %c0_i32, %c0_i32_0 : i32, i32, i32
  }
}

</mosaic_0001>

<bundles_post_ra>
// kernel: tpu_custom_call.1
= control target key start
LH: loop header
LB: loop body
LE: loop exit
PB: predicated region body
PF: predicated region fallthrough
CT: control target
= control target key end

     0   :  { %10 = vsyncpa [#allocation5], 0  ;;  %s1222_s0 = inlined_call_operand.hbm [shape: f32[2,16,256], index: 0, kind: input, shape index: {}]   ;;  %s1223_s1 = inlined_call_operand.vmem [shape: f32[16,4], index: 1, kind: input, shape index: {}]   ;;  %s1224_s2 = inlined_call_operand.vmem [shape: f32[1,4], index: 2, kind: input, shape index: {}]   ;;  %s1225_s3 = inlined_call_operand.vmem [shape: f32[4,16], index: 3, kind: input, shape index: {}]   ;;  %s1226_s4 = inlined_call_operand.vmem [shape: f32[1,16], index: 4, kind: input, shape index: {}]   ;;  %s1227_s5 = inlined_call_operand.hbm [shape: f32[2,1,16], index: 5, kind: output, shape index: {}]  }
   0x1   :  { %12 = vsyncpa [#allocation5 + $0x1], 0 }
   0x2   :  { %13 = vsyncpa [#allocation6], 0 }
   0x3   :  { %15 = vsyncpa [#allocation6 + $0x1], 0  ;;  %s1025_s18 = smov 0   ;;  %s1027_s19 = smov 0  }
   0x4   :  { %s1029_s20 = smov 0   ;;  %s1031_s21 = smov 0  }
   0x5   :  { %s1033_s22 = smov 0   ;;  %s1035_s23 = smov 0  }
   0x6 LB: > { %s738_s24 = sadd.s32 4294967295, %s986_s23   ;;  %s739_s25 = sadd.s32 4294967294, %s986_s23   ;;  %s986_s23 = sphi %s1035_s23, %s21_s23   ;;  %s982_s22 = sphi %s1033_s22, %s1242_s22   ;;  %s978_s21 = sphi %s1031_s21, %s1241_s21   ;;  %s974_s20 = sphi %s1029_s20, %s1240_s20   ;;  %s970_s19 = sphi %s1027_s19, %s1239_s19   ;;  %s966_s18 = sphi %s1025_s18, %s1238_s18  }
   0x7   : > { %s33_s26 = sadd.s32 1, %s982_s22  ;;  %s42_s27 = sadd.s32 1, %s974_s20 }
   0x8   : > { %p35_p0 = scmp.ge.s32.totalorder %s33_s26, 2  ;;  %p49_p1 = scmp.ne.s32.totalorder %s974_s20, %s970_s19 }
   0x9   : > { %p50_p2 = scmp.eq.s32.totalorder %s986_s23, 0  ;;  %p55_p3 = scmp.ne.s32.totalorder %s970_s19, %s966_s18 }
   0xa   : > { %s1244_s26 = smov (%p35_p0, %s33_s26), 0  ;;  %p56_p5 = scmp.eq.s32.totalorder %s738_s24, 0 }
   0xb   : > { %p1066_p4 = por %p50_p2, %p49_p1  ;;  %s37_s29 = ssub.s32 %s982_s22, %s1244_s26 }
   0xc   : > { %p163_p6 = scmp.eq.s32.totalorder %s738_s24, 1  ;;  %p40_p7 = scmp.eq.s32.totalorder %s37_s29, 0 }
   0xd   : > { %p1072_p8 = por %p56_p5, %p55_p3  ;;  %p169_p10 = scmp.eq.s32.totalorder %s739_s25, 1 }
   0xe   : > { %p1076_p9 = por %p163_p6, %p49_p1  ;;  %p811_p13 = scmp.lt.s32.totalorder %s986_s23, 2 }
   0xf   : > { %s1081_s7 = scalar_select %p40_p7, %s974_s20, %s42_s27  }
  0x10   : > { %s1231_s6 = scalar_select %p1076_p9, 1, 0 }
  0x11   : > { %p1083_p11 = por %p169_p10, %p55_p3  ;;  %s201_s9 = sand.u32 1, %s974_s20  }
  0x12   : > { %s742_s10 = sshll.u32 %s201_s9, 5  ;;  %s758_s11 = sshll.u32 %s982_s22, 9 }
  0x13   : > { %s1232_s8 = scalar_select %p1083_p11, 1, 0 }
  0x14   : > { %s1094_s14 = scalar_lea.hbm %s1222_s0, %s758_s11  ;;  %s205_s15 = scalar_lea.vmem [#allocation4], %s742_s10 }
  0x15   : > { %s214_s16 = sshll.u32 %s205_s15, 4  ;;  %p1100_p0 = pnand %p811_p13, %p1066_p4  ;;  %s1096_s16 = int_to_ptr.vmem [resolvable:$true] %s214_s16 }
  0x16   : > { %s1105_s24 = scalar_lea.sflag [#allocation5], %s201_s9  ;;  %s874_s25 = scalar_lea.hbm %s1094_s14, 512 }
  0x17   : > { %p875_p2 = scmp.ne.s32.totalorder %s1094_s14, %s874_s25  ;;  %p876_p3 = pneg %p1100_p0 }
  0x18   : > { %s879_s28 = scalar_lea.hbm %s1222_s0, 1024  ;;  %p880_p4 = scmp.lt.u32.totalorder %s1094_s14, %s1222_s0 }
  0x19   : > { %p877_p5 = pnand %p876_p3, %p875_p2  ;;  %p881_p7 = scmp.lt.u32.totalorder %s879_s28, %s874_s25 }
  0x1a   : > { %p883_p13 = scmp.lt.u32.totalorder %s874_s25, %s1094_s14 }
  0x1b   : > { %p878_p6 = pneg %p877_p5  ;;  %p882_p10 = por %p881_p7, %p880_p4 }
  0x1d   : > { %p884_p12 = por %p883_p13, %p882_p10 }
  0x1f   : > { %p885_p1 = pnand %p884_p12, %p878_p6 }
  0x21   : > { %888 = shalt.err (!%p885_p1)
}
  0x22   : > { %s889_s9 = scalar_lea.vmem %s1096_s16, 512  ;;  %s988_s12 = smov [#allocation4]  }
  0x23   : > { %p890_p2 = scmp.ne.s32.totalorder %s1096_s16, %s889_s9  ;;  %s894_s13 = sshll.u32 %s988_s12, 4  ;;  %s895_s13 = int_to_ptr.vmem [resolvable:$false] %s894_s13 }
  0x24   : > { %s896_s15 = scalar_lea.vmem %s895_s13, 1024  ;;  %p897_p9 = scmp.lt.s32.totalorder %s1096_s16, %s895_s13 }
  0x25   : > { %p892_p5 = pnand %p890_p2, %p876_p3  ;;  %p898_p4 = scmp.lt.s32.totalorder %s896_s15, %s889_s9 }
  0x27   : > { %p893_p11 = pneg %p892_p5  ;;  %p899_p7 = por %p898_p4, %p897_p9 }
  0x29   : > { %p900_p10 = pnand %p899_p7, %p893_p11 }
  0x2b   : > { %903 = shalt.err (!%p900_p10)
}
  0x2c   : > { %s989_s25 = smov 256   ;;  %s990_s27 = smov 16  }
  0x2d   : > { %806 = dma.hbm_to_vmem [thread:$0]  (!%p1100_p0), %s1094_s14, 512, %s1096_s16, %s1105_s24, %s989_s25, %s989_s25, %s990_s27  }
  0x2e   : > { %p222_p12 = scmp.lt.s32.totalorder %s986_s23, 3  ;;  %p1234_p1 = scmp.ge.s32.totalorder %s986_s23, 1 }
  0x30   : > { %p223_p3 = pnand %p1234_p1, %p222_p12 }
  0x31   : > { %s1137_s29 = sand.u32 (!%p223_p3), 1, %s970_s19  }
  0x32   : > { %226 = sbr.rel (%p223_p3) target bundleno = 904 (0x388), region = 40  ;;  %s746_s28 = sshll.u32 (!%p223_p3), %s1137_s29, 5 }
  0x33   : > { %s229_s10 = scalar_lea.sflag (!%p223_p3), [#allocation5], %s1137_s29  ;;  %s232_s11 = scalar_lea.vmem (!%p223_p3), [#allocation4], %s746_s28 }
  0x39   : > { %957 = dma.done.wait (%p1072_p8), %s229_s10, 512  }
  0x3a   : > { %959 = vsyncadd (%p1072_p8), %s229_s10, 4294966784  ;;  %v271_v0 = vld [vmem:[%s232_s11] sm:$0xff]  ;;  %v277_v1 = vld [vmem:[%s232_s11 + $0x8] sm:$0xff]  ;;  %v991_v9 = vmov 0.0|0.0   ;;  %vm992_vm0 = vmmov 0   ;;  %v993_v10 = vmov 0.0   ;;  %v309_v13 = vlaneseq }
  0x3b   : > { %v272_v2 = vld [vmem:[%s232_s11 + $0x10] sm:$0xff]  ;;  %v279_v3 = vadd.f32 %v277_v1, %v271_v0  ;;  %v278_v4 = vld [vmem:[%s232_s11 + $0x18] sm:$0xff]  ;;  %v304_v6 = vld [vmem:[%s1223_s1] sm:$0xff]  ;;  %793 = vmatprep.subr.bf16.mxu0 %v991_v9  ;;  %773 = vmatprep.mubr.msk.f32.mxu0 %vm992_vm0, %v993_v10  ;;  %v281_v11 = vmax.f32 %v271_v0, %v277_v1  ;;  %vm320_vm1 = vcmask 130112   ;;  %vm322_vm2 = vcmask 130048   ;;  %s755_s27 = sshll.u32 %s978_s21, 4 }
  0x3c   : > { %v280_v5 = vadd.f32 %v278_v4, %v272_v2  ;;  %v305_v7 = vld [vmem:[%s1223_s1 + $0x8] sm:$0xff]  ;;  %776 = vmatprep.subr.mxu1 %v993_v10  ;;  %778 = vmatprep.mubr.msk.f32.mxu1 %vm992_vm0, %v993_v10  ;;  %v282_v12 = vmax.f32 %v272_v2, %v278_v4  ;;  %v310_v14 = vand.u32 127, %v309_v13  ;;  %v312_v15 = vshrl.u32 %v309_v13, 7  ;;  %v396_v26 = vld [vmem:[%s1225_s3] sm:$0xf]  ;;  %s257_s28 = scalar_lea.vmem [#allocation7], %s1137_s29  ;;  %s1173_s16 = scalar_lea.hbm %s1227_s5, %s755_s27 }
  0x3d   : > { %292 = vadd.xlane.f32.xlu0 %v279_v3  ;;  %v794_v8 = vpack.c.bf16 %v305_v7, %v304_v6  ;;  %300 = vmax.xlane.f32.xlu1 %v281_v11  ;;  %vm402_vm3 = vcmask 1043456   ;;  %v306_v28 = vld [vmem:[%s1224_s2] sm:$0x1]  ;;  %vm398_vm4 = vcmask 31744   ;;  %s661_s10 = sshll.u32 %s257_s28, 4  ;;  %vm646_vm5 = vcmask 122880   ;;  %s1175_s10 = int_to_ptr.vmem [resolvable:$true] %s661_s10 }
  0x3e   : > { %v315_v16 = vadd.s32 4294967288, %v310_v14  ;;  %v313_v18 = vsub.s32 %v310_v14, %v312_v15  ;;  %777 = vmatpush3.msk.msra.mxu1 %vm402_vm3, %v396_v26  ;;  %v397_v43 = vld [vmem:[%s1226_s4] sm:$0x1]  ;;  %s649_s17 = scalar_lea.sflag [#allocation6], %s1137_s29  ;;  %s904_s24 = scalar_lea.vmem %s1175_s10, 16 }
  0x3f   : > { %795 = vmatpush3.bf16.msra.mxu0 %v794_v8  ;;  %796 = vmatprep.subr.bf16.mxu1 %v991_v9  ;;  %p905_p8 = scmp.ne.s32.totalorder %s1175_s10, %s904_s24  ;;  %p1235_p9 = scmp.ne.s32.totalorder %s1231_s6, 0 }
  0x40   : > { %788 = vmatprep.subr.mxu0 %v993_v10  ;;  %v318_v20 = vsub.s32 %v315_v16, %v312_v15  ;;  %s994_s21 = smov [#allocation7]  }
  0x41   : > { %294 = vadd.xlane.f32.xlu0 %v280_v5  ;;  %302 = vmax.xlane.f32.xlu1 %v282_v12  ;;  %p906_p11 = pnand %p905_p8, %p1235_p9  ;;  %s908_s30 = sshll.u32 %s994_s21, 4  ;;  %s909_s30 = int_to_ptr.vmem [resolvable:$false] %s908_s30 }
  0x42   : > { %s910_s9 = scalar_lea.vmem %s909_s30, 32  ;;  %p911_p6 = scmp.lt.s32.totalorder %s1175_s10, %s909_s30 }
  0x43   : > { %p907_p0 = pneg %p906_p11  ;;  %p912_p13 = scmp.lt.s32.totalorder %s910_s9, %s904_s24 }
  0x45   : > { %p913_p2 = por %p912_p13, %p911_p6 }
  0x47   : > { %p914_p5 = pnand %p913_p2, %p907_p0 }
  0xca   : > { %v293_v17 = vpop.xlane.xlu0 %292  ;;  %v301_v27 = vpop.xlane.xlu1 %300 }
  0xcb   : > { %v296_v19 = vmul.f32 0.00390625, %v293_v17  ;;  %v487_v34 = vrot.slane %v301_v27, %v313_v18 }
  0xcd   : > { %v314_v23 = vrot.slane %v296_v19, %v313_v18 }
  0xce   : > { %v295_v21 = vpop.xlane.xlu0 %294  ;;  %v303_v31 = vpop.xlane.xlu1 %302 }
  0xcf   : > { %v297_v22 = vmul.f32 0.00390625, %v295_v21  ;;  %v491_v35 = vrot.slane %v303_v31, %v318_v20 }
  0xd1   : > { %v319_v24 = vrot.slane %v297_v22, %v318_v20  ;;  %v492_v36 = vsel %vm320_vm1, %v491_v35, %v487_v34 }
  0xd3   : > { %v321_v25 = vsel %vm320_vm1, %v319_v24, %v314_v23 }
  0xd4   : > { %774 = vmatmul.mubr.msk.f32.vlgmr.msra.gmra.mrb[0].mxu0 %vm322_vm2, %v321_v25 }
  0xd5   : > { %790 = vmatprep.mubr.msk.f32.mxu0 %vm992_vm0, %v993_v10  ;;  %789 = vmatpush3.msk.msra.mxu0 %vm402_vm3, %v396_v26 }
 0x1a7   : > { %v391_v29 = vpop.f32.mrb[0].mxu0 }
 0x1a8   : > { %v392_v30 = vadd.f32 %v391_v29, %v306_v28  ;;  %v775_v32 = vpop.f32.mrb[1].mxu0 }
 0x1aa   : > { %v395_v33 = vmax.f32 %v392_v30, 0.0 }
 0x1ac   : > { %779 = vmatmul.mubr.msk.f32.vlgmr.msra.gmra.mrb[0].mxu1 %vm398_vm4, %v395_v33 }
 0x1ad   : > { %798 = vmatpush3.bf16.msra.mxu1 %v794_v8  ;;  %785 = vmatprep.mubr.msk.f32.mxu1 %vm992_vm0, %v993_v10 }
 0x1b0   : > { %786 = vmatmul.mubr.msk.f32.vlgmr.msra.gmra.mrb[2].mxu1 %vm322_vm2, %v492_v36 }
 0x27f   : > { %v472_v37 = vpop.f32.mrb[0].mxu1 }
 0x280   : > { %v780_v38 = vpop.f32.mrb[1].mxu1  ;;  %v473_v44 = vadd.f32 %v472_v37, %v397_v43 }
 0x282   : > { %v750_v45 = vmul.f32 -1.442695, %v473_v44 }
 0x283   : > { %v561_v39 = vpop.f32.mrb[2].mxu1 }
 0x284   : > { %v562_v40 = vadd.f32 %v561_v39, %v306_v28  ;;  %v787_v41 = vpop.f32.mrb[3].mxu1  ;;  %866 = vpow2.f32 %v750_v45 }
 0x286   : > { %v565_v42 = vmax.f32 %v562_v40, 0.0 }
 0x288   : > { %791 = vmatmul.mubr.msk.f32.vlgmr.msra.gmra.mrb[2].mxu0 %vm398_vm4, %v565_v42 }
 0x28e   : > { %v867_v50 = vpop.eup %866 }
 0x28f   : > { %v479_v51 = vadd.f32 1.0, %v867_v50 }
 0x35b   : > { %v635_v46 = vpop.f32.mrb[2].mxu0 }
 0x35c   : > { %v636_v47 = vadd.f32 %v635_v46, %v397_v43  ;;  %v792_v48 = vpop.f32.mrb[3].mxu0 }
 0x35e   : > { %v754_v49 = vmul.f32 -1.442695, %v636_v47 }
 0x360   : > { %868 = vpow2.f32 %v754_v49 }
 0x361   : > { %870 = vrcp.f32 %v479_v51 }
 0x36a   : > { %v869_v52 = vpop.eup %868 }
 0x36b   : > { %v642_v53 = vadd.f32 1.0, %v869_v52  ;;  %v871_v54 = vpop.eup %870 }
 0x36d   : > { %872 = vrcp.f32 %v642_v53 }
 0x377   : > { %v873_v55 = vpop.eup %872 }
 0x378   : > { %v645_v56 = vadd.f32 %v873_v55, %v871_v54 }
 0x37a   : > { %647 = vst.msk [vmem:[%s257_s28] sm:$0x1] %vm646_vm5, %v645_v56 }
 0x37b   : > { %917 = shalt.err (!%p914_p5)
}
 0x37c   : > { %s918_s29 = scalar_lea.hbm %s1173_s16, 16  ;;  %s922_s15 = scalar_lea.hbm %s1227_s5, 32 }
 0x37d   : > { %p919_p4 = scmp.ne.s32.totalorder %s1173_s16, %s918_s29  ;;  %p923_p12 = scmp.lt.u32.totalorder %s1173_s16, %s1227_s5 }
 0x37e   : > { %p924_p1 = scmp.lt.u32.totalorder %s922_s15, %s918_s29  ;;  %p926_p8 = scmp.lt.u32.totalorder %s918_s29, %s1173_s16 }
 0x37f   : > { %p920_p7 = pnand %p919_p4, %p1235_p9 }
 0x380   : > { %p925_p3 = por %p924_p1, %p923_p12 }
 0x381   : > { %p921_p10 = pneg %p920_p7 }
 0x382   : > { %p927_p11 = por %p926_p8, %p925_p3 }
 0x384   : > { %p928_p0 = pnand %p927_p11, %p921_p10 }
 0x386   : > { %931 = shalt.err (!%p928_p0)
}
 0x387   : > { %801 = dma.vmem_to_hbm [thread:$0]  (%p1235_p9), %s1175_s10, 16, %s1173_s16, %s649_s17  }
 0x388 PF: > { %s673_s28 = sand.u32 1, %s966_s18   ;;  %p1236_p6 = scmp.ne.s32.totalorder %s1232_s8, 0 }
 0x389   : > { %p1237_p13 = scmp.ge.s32.totalorder %s986_s23, 2  ;;  %s674_s11 = scalar_lea.sflag [#allocation6], %s673_s28 }
 0x38b   : > { %p808_p2 = pnand %p1237_p13, %p1236_p6 }
 0x38d   : > { %961 = dma.done.wait (!%p808_p2), %s674_s11, 16  }
 0x38e   : > { %963 = vsyncadd (!%p808_p2), %s674_s11, 4294967280  ;;  %s21_s23 = sadd.s32 1, %s986_s23   ;;  %s1238_s18 = smov %s970_s19 }
 0x38f   : > { %p18_p5 = scmp.ge.s32.totalorder %s21_s23, 4   ;;  %s1239_s19 = smov %s974_s20 }
 0x390   : > { %s1240_s20 = smov %s1081_s7  ;;  %s1241_s21 = smov %s982_s22 }
 0x391   : > { %s1242_s22 = smov %s1244_s26  ;;  %20 = sbr.rel (!%p18_p5) target bundleno = 6 (0x6), region = 93 }
 0x398   :  { %678 = vsyncpa [#allocation5], 1 }
 0x399   :  { %680 = vsyncpa [#allocation5 + $0x1], 1 }
 0x39a   :  { %681 = vsyncpa [#allocation6], 1 }
 0x39b   :  { %683 = vsyncpa [#allocation6 + $0x1], 1 }

</bundles_post_ra>
